<compile_context>
chip_gen: v6e
topology: v6e:2x2x1
jax: 0.10.0
libtpu: 0.0.40
codegen_flags: <defaults>
</compile_context>

<pallas_src>
import functools

import jax
import jax.numpy as jnp
from jax.experimental import pallas as pl
from jax.experimental.pallas import tpu as pltpu

NUM_LAYERS = 10
FEAT = 10
PACK = 64                      # rows packed per lane-group: PACK*FEAT = 640 = 5*128
PACKED_FEAT = PACK * FEAT      # 640

_SMALL_PACKED_ROWS = 1024      # grid-less path if packed rows <= this (~6.6 MiB VMEM)
_PACKED_TILE_MIN = 256         # >= ~0.6 MiB per block
_PACKED_TILE_MAX = 1024        # <= ~2.5 MiB per block (fits 32 MiB scoped VMEM w/ 2x buf)
_TARGET_GRID_STEPS = 8         # keep the grid long enough for v7x's 2 TCs + pipelining


def _round_up(n, m):
    return (n + m - 1) // m * m


def fold_affine_params(w, b):
    """Fold the 10 affine stages into one packed matrix + bias.

    Stage i: x <- x @ (W[i//2] + W[i]).T + (b[i//2] + b[i]).
    M is kept (in, out) so the kernel needs no transpose.  The folded (10,10)
    matrix is then expanded to a block-diagonal (640,640) matrix so 64 logical
    rows can ride in one lane-dense packed row.
    """
    m = jnp.eye(FEAT, dtype=jnp.float32)
    c = jnp.zeros((1, FEAT), dtype=jnp.float32)
    for i in range(NUM_LAYERS):
        j = i // 2
        wc = (w[j] + w[i]).T            # (in, out)
        bc = (b[j] + b[i])[None, :]     # (1, FEAT)
        m = m @ wc
        c = c @ wc + bc
    m_big = jnp.kron(jnp.eye(PACK, dtype=jnp.float32), m)   # (640, 640) block-diag
    c_big = jnp.tile(c, (1, PACK))                           # (1, 640)
    return m_big, c_big


def affine_kernel(x_ref, m_ref, c_ref, o_ref):
    # One MXU matmul + VPU bias add on lane-dense (tile, 640) blocks.
    x = x_ref[...]
    y = jnp.dot(x, m_ref[...], preferred_element_type=jnp.float32) + c_ref[...]
    o_ref[...] = y.astype(o_ref.dtype)


def _forward_impl(x, w, b, force_gridded=False):
    B, F = x.shape
    assert F == FEAT, f"expected feature dim {FEAT}, got {F}"

    m_big, c_big = fold_affine_params(w, b)

    # Pad batch to a multiple of the pack factor, then pack 64 rows per row.
    b_pad = _round_up(B, PACK)
    if b_pad != B:
        x = jnp.pad(x, ((0, b_pad - B), (0, 0)))
    bp = b_pad // PACK
    xp = x.reshape(bp, PACKED_FEAT)          # free row-major view
    out_dtype = x.dtype

    use_grid = force_gridded or bp > _SMALL_PACKED_ROWS

    if not use_grid:
        # Small: whole problem resident in VMEM, grid-less call.
        yp = pl.pallas_call(
            affine_kernel,
            out_shape=jax.ShapeDtypeStruct((bp, PACKED_FEAT), out_dtype),
            in_specs=[
                pl.BlockSpec(memory_space=pltpu.MemorySpace.VMEM),
                pl.BlockSpec(memory_space=pltpu.MemorySpace.VMEM),
                pl.BlockSpec(memory_space=pltpu.MemorySpace.VMEM),
            ],
            out_specs=pl.BlockSpec(memory_space=pltpu.MemorySpace.VMEM),
            compiler_params=pltpu.CompilerParams(
                vmem_limit_bytes=32 * 1024 * 1024),
        )(xp, m_big, c_big)
    else:
        # Large: 1-D grid over packed rows.  Tile sized for MiB-scale blocks
        # while keeping >= ~_TARGET_GRID_STEPS steps so both v7x TCs get work.
        tile = min(
            _PACKED_TILE_MAX,
            max(_PACKED_TILE_MIN,
                _round_up(pl.cdiv(bp, _TARGET_GRID_STEPS), 8)),
        )
        bp_pad = _round_up(bp, tile)
        if bp_pad != bp:
            xp = jnp.pad(xp, ((0, bp_pad - bp), (0, 0)))
        grid = (bp_pad // tile,)
        yp = pl.pallas_call(
            affine_kernel,
            out_shape=jax.ShapeDtypeStruct((bp_pad, PACKED_FEAT), out_dtype),
            grid=grid,
            in_specs=[
                pl.BlockSpec((tile, PACKED_FEAT), lambda i: (i, 0)),
                pl.BlockSpec((PACKED_FEAT, PACKED_FEAT), lambda i: (0, 0)),
                pl.BlockSpec((1, PACKED_FEAT), lambda i: (0, 0)),
            ],
            out_specs=pl.BlockSpec((tile, PACKED_FEAT), lambda i: (i, 0)),
            compiler_params=pltpu.CompilerParams(
                dimension_semantics=("parallel",),
                vmem_limit_bytes=32 * 1024 * 1024),
        )(xp, m_big, c_big)
        yp = yp[:bp]

    y = yp.reshape(b_pad, FEAT)              # free view back to (B_pad, 10)
    if b_pad != B:
        y = y[:B]
    return y


# jit the whole thing so parameter folding is compiled once and cached.
module_list_forward = jax.jit(_forward_impl, static_argnames=("force_gridded",))


def init_params(key):
    # Deterministic init mimicking nn.Linear's default U(-1/sqrt(in), 1/sqrt(in)).
    kw, kb = jax.random.split(key)
    bound = 1.0 / jnp.sqrt(jnp.float32(FEAT))
    w = jax.random.uniform(kw, (NUM_LAYERS, FEAT, FEAT), jnp.float32, -bound, bound)
    b = jax.random.uniform(kb, (NUM_LAYERS, FEAT), jnp.float32, -bound, bound)
    return w, b


def reference_forward(x, w, b):
    # Plain-JAX transcription of the PyTorch forward for checking.
    for i in range(NUM_LAYERS):
        j = i // 2
        x = (x @ w[j].T + b[j]) + (x @ w[i].T + b[i])
    return x


if __name__ == "__main__":
    key = jax.random.PRNGKey(0)
    kx, kp = jax.random.split(key)
    w, b = init_params(kp)

    # 1) Small batch (pads 8 -> 64 logical rows, grid-less packed path).
    batch = 8
    x = jax.random.normal(kx, (batch, FEAT), jnp.float32)
    out = module_list_forward(x, w, b)
    jax.block_until_ready(out)
    ref = reference_forward(x, w, b)
    assert out.shape == (batch, FEAT)
    assert jnp.allclose(out, ref, rtol=1e-3, atol=1e-3), "small-batch mismatch vs reference"

    # 2) Medium batch not a multiple of the pack factor (remainder handling).
    batch_mid = 1000
    xm = jax.random.normal(jax.random.PRNGKey(1), (batch_mid, FEAT), jnp.float32)
    outm = module_list_forward(xm, w, b)
    jax.block_until_ready(outm)
    refm = reference_forward(xm, w, b)
    assert outm.shape == (batch_mid, FEAT)
    assert jnp.allclose(outm, refm, rtol=1e-3, atol=1e-3), "mid-batch mismatch vs reference"

    # 3) Exercise the gridded (large-batch) path explicitly at a modest size.
    batch_big = 4096
    xb = jax.random.normal(jax.random.PRNGKey(2), (batch_big, FEAT), jnp.float32)
    outb = module_list_forward(xb, w, b, force_gridded=True)
    jax.block_until_ready(outb)
    refb = reference_forward(xb, w, b)
    assert outb.shape == (batch_big, FEAT)
    assert jnp.allclose(outb, refb, rtol=1e-3, atol=1e-3), "gridded-path mismatch vs reference"

    print("KERNEL_OK")
</pallas_src>

<mosaic_0001>
module attributes {stable_mosaic.version = 11 : i64} {
  func.func @affine_kernel(%arg0: memref<1x640xf32, #tpu.memory_space<vmem>>, %arg1: memref<640x640xf32, #tpu.memory_space<vmem>>, %arg2: memref<1x640xf32, #tpu.memory_space<vmem>>, %arg3: memref<1x640xf32, #tpu.memory_space<vmem>>) attributes {dimension_semantics = [], scalar_prefetch = 0 : i64, scratch_operands = 0 : i64, tpu.core_type = #tpu.core_type<tc>} {
    %c0 = arith.constant 0 : index
    %c0_0 = arith.constant 0 : index
    %0 = vector.load %arg0[%c0, %c0_0] : memref<1x640xf32, #tpu.memory_space<vmem>>, vector<1x640xf32>
    %c0_1 = arith.constant 0 : index
    %c0_2 = arith.constant 0 : index
    %1 = vector.load %arg1[%c0_1, %c0_2] : memref<640x640xf32, #tpu.memory_space<vmem>>, vector<640x640xf32>
    %cst = arith.constant dense<0.000000e+00> : vector<1x640xf32>
    %2 = tpu.matmul %0, %1, %cst {dimension_numbers = #tpu.dot_dimension_numbers<[1], [0], [0], [1], [0, 0, 1, 1], [], []>} : vector<1x640xf32>, vector<640x640xf32>, vector<1x640xf32> -> vector<1x640xf32>
    %c0_3 = arith.constant 0 : index
    %c0_4 = arith.constant 0 : index
    %3 = vector.load %arg2[%c0_3, %c0_4] : memref<1x640xf32, #tpu.memory_space<vmem>>, vector<1x640xf32>
    %4 = arith.addf %2, %3 : vector<1x640xf32>
    %c0_5 = arith.constant 0 : index
    %c0_6 = arith.constant 0 : index
    %5 = vector.load %arg3[%c0_5, %c0_6] : memref<1x640xf32, #tpu.memory_space<vmem>>, vector<1x640xf32>
    tpu.vector_store %arg3[%c0_5, %c0_6], %4 {strides = array<i32>} : memref<1x640xf32, #tpu.memory_space<vmem>>, vector<1x640xf32>,
    return
  }
}

</mosaic_0001>

<bundles_post_ra>
// kernel: _forward_impl.1
= control target key start
LH: loop header
LB: loop body
LE: loop exit
PB: predicated region body
PF: predicated region fallthrough
CT: control target
= control target key end

     0   :  { %vm1284_vm0 = vmmov 0   ;;  %s2596_s1 = inlined_call_operand.vmem [shape: f32[640,640], index: 1, kind: input, shape index: {}]   ;;  %s2597_s0 = inlined_call_operand.vmem [shape: f32[1,640], index: 0, kind: input, shape index: {}]   ;;  %s2598_s2 = inlined_call_operand.vmem [shape: f32[1,640], index: 2, kind: input, shape index: {}]   ;;  %s2599_s3 = inlined_call_operand.vmem [shape: f32[1,640], index: 3, kind: output, shape index: {}]  }
   0x1   :  { %v91_v0 = vld [vmem:[%s2596_s1 + $0x260] sm:$0xff]  ;;  %v90_v1 = vld [vmem:[%s2596_s1 + $0x258] sm:$0xff]  ;;  %v85_v4 = vld [vmem:[%s2596_s1 + $0x230] sm:$0xff] }
   0x2   :  { %v86_v2 = vld [vmem:[%s2596_s1 + $0x238] sm:$0xff]  ;;  %468 = vmatprep.subr.mxu0 %v91_v0  ;;  %v251_v3 = vld [vmem:[%s2596_s1 + $0x760] sm:$0xff]  ;;  %v81_v6 = vld [vmem:[%s2596_s1 + $0x210] sm:$0xff] }
   0x3   :  { %v250_v5 = vld [vmem:[%s2596_s1 + $0x758] sm:$0xff]  ;;  %469 = vmatpush1.msra.mxu0 %v90_v1  ;;  %539 = vmatprep.subr.mxu1 %v251_v3  ;;  %v80_v8 = vld [vmem:[%s2596_s1 + $0x208] sm:$0xff]  ;;  %v245_v9 = vld [vmem:[%s2596_s1 + $0x730] sm:$0xff] }
   0x4   :  { %v246_v7 = vld [vmem:[%s2596_s1 + $0x738] sm:$0xff]  ;;  %470 = vmatprep.subr.mxu0 %v86_v2  ;;  %540 = vmatpush1.msra.mxu1 %v250_v5  ;;  %v241_v10 = vld [vmem:[%s2596_s1 + $0x710] sm:$0xff]  ;;  %v76_v11 = vld [vmem:[%s2596_s1 + $0x1e8] sm:$0xff] }
   0x5   :  { %471 = vmatpush1.msra.mxu0 %v85_v4  ;;  %541 = vmatprep.subr.mxu1 %v246_v7  ;;  %v240_v12 = vld [vmem:[%s2596_s1 + $0x708] sm:$0xff]  ;;  %v75_v13 = vld [vmem:[%s2596_s1 + $0x1e0] sm:$0xff]  ;;  %v70_v17 = vld [vmem:[%s2596_s1 + $0x1b8] sm:$0xff] }
   0x6   :  { %472 = vmatprep.subr.mxu0 %v81_v6  ;;  %542 = vmatpush1.msra.mxu1 %v245_v9  ;;  %v236_v14 = vld [vmem:[%s2596_s1 + $0x6e8] sm:$0xff]  ;;  %v71_v15 = vld [vmem:[%s2596_s1 + $0x1c0] sm:$0xff]  ;;  %v66_v19 = vld [vmem:[%s2596_s1 + $0x198] sm:$0xff] }
   0x7   :  { %473 = vmatpush1.msra.mxu0 %v80_v8  ;;  %543 = vmatprep.subr.mxu1 %v241_v10  ;;  %v235_v16 = vld [vmem:[%s2596_s1 + $0x6e0] sm:$0xff]  ;;  %v230_v20 = vld [vmem:[%s2596_s1 + $0x6b8] sm:$0xff]  ;;  %v65_v21 = vld [vmem:[%s2596_s1 + $0x190] sm:$0xff] }
   0x8   :  { %474 = vmatprep.subr.mxu0 %v76_v11  ;;  %544 = vmatpush1.msra.mxu1 %v240_v12  ;;  %v231_v18 = vld [vmem:[%s2596_s1 + $0x6c0] sm:$0xff]  ;;  %v226_v22 = vld [vmem:[%s2596_s1 + $0x698] sm:$0xff]  ;;  %v61_v23 = vld [vmem:[%s2596_s1 + $0x170] sm:$0xff] }
   0x9   :  { %475 = vmatpush1.msra.mxu0 %v75_v13  ;;  %545 = vmatprep.subr.mxu1 %v236_v14  ;;  %v225_v24 = vld [vmem:[%s2596_s1 + $0x690] sm:$0xff]  ;;  %v60_v25 = vld [vmem:[%s2596_s1 + $0x168] sm:$0xff]  ;;  %v55_v29 = vld [vmem:[%s2596_s1 + $0x140] sm:$0xff] }
   0xa   :  { %476 = vmatprep.subr.mxu0 %v71_v15  ;;  %546 = vmatpush1.msra.mxu1 %v235_v16  ;;  %v221_v26 = vld [vmem:[%s2596_s1 + $0x670] sm:$0xff]  ;;  %v56_v27 = vld [vmem:[%s2596_s1 + $0x148] sm:$0xff]  ;;  %v51_v31 = vld [vmem:[%s2596_s1 + $0x120] sm:$0xff] }
   0xb   :  { %477 = vmatpush1.msra.mxu0 %v70_v17  ;;  %547 = vmatprep.subr.mxu1 %v231_v18  ;;  %v220_v28 = vld [vmem:[%s2596_s1 + $0x668] sm:$0xff]  ;;  %v215_v32 = vld [vmem:[%s2596_s1 + $0x640] sm:$0xff]  ;;  %v50_v33 = vld [vmem:[%s2596_s1 + $0x118] sm:$0xff] }
   0xc   :  { %478 = vmatprep.subr.mxu0 %v66_v19  ;;  %548 = vmatpush1.msra.mxu1 %v230_v20  ;;  %v216_v30 = vld [vmem:[%s2596_s1 + $0x648] sm:$0xff]  ;;  %v211_v34 = vld [vmem:[%s2596_s1 + $0x620] sm:$0xff]  ;;  %v46_v35 = vld [vmem:[%s2596_s1 + $0xf8] sm:$0xff] }
   0xd   :  { %479 = vmatpush1.msra.mxu0 %v65_v21  ;;  %549 = vmatprep.subr.mxu1 %v226_v22  ;;  %v210_v36 = vld [vmem:[%s2596_s1 + $0x618] sm:$0xff]  ;;  %v45_v37 = vld [vmem:[%s2596_s1 + $0xf0] sm:$0xff]  ;;  %v40_v41 = vld [vmem:[%s2596_s1 + $0xc8] sm:$0xff] }
   0xe   :  { %480 = vmatprep.subr.mxu0 %v61_v23  ;;  %550 = vmatpush1.msra.mxu1 %v225_v24  ;;  %v206_v38 = vld [vmem:[%s2596_s1 + $0x5f8] sm:$0xff]  ;;  %v41_v39 = vld [vmem:[%s2596_s1 + $0xd0] sm:$0xff]  ;;  %v36_v43 = vld [vmem:[%s2596_s1 + $0xa8] sm:$0xff] }
   0xf   :  { %481 = vmatpush1.msra.mxu0 %v60_v25  ;;  %551 = vmatprep.subr.mxu1 %v221_v26  ;;  %v205_v40 = vld [vmem:[%s2596_s1 + $0x5f0] sm:$0xff]  ;;  %v200_v44 = vld [vmem:[%s2596_s1 + $0x5c8] sm:$0xff]  ;;  %v35_v45 = vld [vmem:[%s2596_s1 + $0xa0] sm:$0xff] }
  0x10   :  { %482 = vmatprep.subr.mxu0 %v56_v27  ;;  %552 = vmatpush1.msra.mxu1 %v220_v28  ;;  %v201_v42 = vld [vmem:[%s2596_s1 + $0x5d0] sm:$0xff]  ;;  %v196_v46 = vld [vmem:[%s2596_s1 + $0x5a8] sm:$0xff]  ;;  %v31_v47 = vld [vmem:[%s2596_s1 + $0x80] sm:$0xff] }
  0x11   :  { %483 = vmatpush1.msra.mxu0 %v55_v29  ;;  %553 = vmatprep.subr.mxu1 %v216_v30  ;;  %v195_v48 = vld [vmem:[%s2596_s1 + $0x5a0] sm:$0xff]  ;;  %v30_v49 = vld [vmem:[%s2596_s1 + $0x78] sm:$0xff]  ;;  %v25_v53 = vld [vmem:[%s2596_s1 + $0x50] sm:$0xff] }
  0x12   :  { %484 = vmatprep.subr.mxu0 %v51_v31  ;;  %554 = vmatpush1.msra.mxu1 %v215_v32  ;;  %v191_v50 = vld [vmem:[%s2596_s1 + $0x580] sm:$0xff]  ;;  %v26_v51 = vld [vmem:[%s2596_s1 + $0x58] sm:$0xff]  ;;  %v21_v55 = vld [vmem:[%s2596_s1 + $0x30] sm:$0xff] }
  0x13   :  { %485 = vmatpush1.msra.mxu0 %v50_v33  ;;  %555 = vmatprep.subr.mxu1 %v211_v34  ;;  %v190_v52 = vld [vmem:[%s2596_s1 + $0x578] sm:$0xff]  ;;  %v185_v56 = vld [vmem:[%s2596_s1 + $0x550] sm:$0xff]  ;;  %v20_v57 = vld [vmem:[%s2596_s1 + $0x28] sm:$0xff] }
  0x14   :  { %486 = vmatprep.subr.mxu0 %v46_v35  ;;  %556 = vmatpush1.msra.mxu1 %v210_v36  ;;  %v186_v54 = vld [vmem:[%s2596_s1 + $0x558] sm:$0xff]  ;;  %v181_v58 = vld [vmem:[%s2596_s1 + $0x530] sm:$0xff]  ;;  %v16_v59 = vld [vmem:[%s2596_s1 + $0x8] sm:$0xff]  ;;  %v417_v35 = vlaneseq }
  0x15   :  { %487 = vmatpush1.msra.mxu0 %v45_v37  ;;  %557 = vmatprep.subr.mxu1 %v206_v38  ;;  %v180_v60 = vld [vmem:[%s2596_s1 + $0x528] sm:$0xff]  ;;  %v15_v61 = vld [vmem:[%s2596_s1] sm:$0xff]  ;;  %v170_v1 = vld [vmem:[%s2596_s1 + $0x4d8] sm:$0xff] }
  0x16   :  { %488 = vmatprep.subr.mxu0 %v41_v39  ;;  %558 = vmatpush1.msra.mxu1 %v205_v40  ;;  %v176_v62 = vld [vmem:[%s2596_s1 + $0x508] sm:$0xff]  ;;  %v171_v63 = vld [vmem:[%s2596_s1 + $0x4e0] sm:$0xff]  ;;  %v166_v3 = vld [vmem:[%s2596_s1 + $0x4b8] sm:$0xff]  ;;  %vm1151_vm1 = vcmp.lt.s32.totalorder %v417_v35, 640 }
  0x17   :  { %489 = vmatpush1.msra.mxu0 %v40_v41  ;;  %559 = vmatprep.subr.mxu1 %v201_v42  ;;  %v175_v0 = vld [vmem:[%s2596_s1 + $0x500] sm:$0xff]  ;;  %v330_v4 = vld [vmem:[%s2596_s1 + $0x9d8] sm:$0xff]  ;;  %v165_v5 = vld [vmem:[%s2596_s1 + $0x4b0] sm:$0xff] }
  0x18   :  { %490 = vmatprep.subr.mxu0 %v36_v43  ;;  %560 = vmatpush1.msra.mxu1 %v200_v44  ;;  %v331_v2 = vld [vmem:[%s2596_s1 + $0x9e0] sm:$0xff]  ;;  %v326_v6 = vld [vmem:[%s2596_s1 + $0x9b8] sm:$0xff]  ;;  %v161_v7 = vld [vmem:[%s2596_s1 + $0x490] sm:$0xff]  ;;  %v1628_v44 = vshrl.u32 %v417_v35, 7 }
  0x19   :  { %491 = vmatpush1.msra.mxu0 %v35_v45  ;;  %561 = vmatprep.subr.mxu1 %v196_v46  ;;  %v325_v8 = vld [vmem:[%s2596_s1 + $0x9b0] sm:$0xff]  ;;  %v160_v9 = vld [vmem:[%s2596_s1 + $0x488] sm:$0xff]  ;;  %v155_v13 = vld [vmem:[%s2596_s1 + $0x460] sm:$0xff] }
  0x1a   :  { %492 = vmatprep.subr.mxu0 %v31_v47  ;;  %562 = vmatpush1.msra.mxu1 %v195_v48  ;;  %v321_v10 = vld [vmem:[%s2596_s1 + $0x990] sm:$0xff]  ;;  %v156_v11 = vld [vmem:[%s2596_s1 + $0x468] sm:$0xff]  ;;  %v151_v15 = vld [vmem:[%s2596_s1 + $0x440] sm:$0xff] }
  0x1b   :  { %493 = vmatpush1.msra.mxu0 %v30_v49  ;;  %563 = vmatprep.subr.mxu1 %v191_v50  ;;  %v320_v12 = vld [vmem:[%s2596_s1 + $0x988] sm:$0xff]  ;;  %v315_v16 = vld [vmem:[%s2596_s1 + $0x960] sm:$0xff]  ;;  %v150_v17 = vld [vmem:[%s2596_s1 + $0x438] sm:$0xff] }
  0x1c   :  { %494 = vmatprep.subr.mxu0 %v26_v51  ;;  %564 = vmatpush1.msra.mxu1 %v190_v52  ;;  %v316_v14 = vld [vmem:[%s2596_s1 + $0x968] sm:$0xff]  ;;  %v311_v18 = vld [vmem:[%s2596_s1 + $0x940] sm:$0xff]  ;;  %v146_v19 = vld [vmem:[%s2596_s1 + $0x418] sm:$0xff] }
  0x1d   :  { %495 = vmatpush1.msra.mxu0 %v25_v53  ;;  %565 = vmatprep.subr.mxu1 %v186_v54  ;;  %v310_v20 = vld [vmem:[%s2596_s1 + $0x938] sm:$0xff]  ;;  %v145_v21 = vld [vmem:[%s2596_s1 + $0x410] sm:$0xff]  ;;  %v140_v25 = vld [vmem:[%s2596_s1 + $0x3e8] sm:$0xff]  ;;  %v423_v53 = vsub.s32 1, %v1628_v44 }
  0x1e   :  { %496 = vmatprep.subr.mxu0 %v21_v55  ;;  %566 = vmatpush1.msra.mxu1 %v185_v56  ;;  %v306_v22 = vld [vmem:[%s2596_s1 + $0x918] sm:$0xff]  ;;  %v141_v23 = vld [vmem:[%s2596_s1 + $0x3f0] sm:$0xff]  ;;  %v136_v27 = vld [vmem:[%s2596_s1 + $0x3c8] sm:$0xff] }
  0x1f   :  { %497 = vmatpush1.msra.mxu0 %v20_v57  ;;  %567 = vmatprep.subr.mxu1 %v181_v58  ;;  %v305_v24 = vld [vmem:[%s2596_s1 + $0x910] sm:$0xff]  ;;  %v300_v28 = vld [vmem:[%s2596_s1 + $0x8e8] sm:$0xff]  ;;  %v135_v29 = vld [vmem:[%s2596_s1 + $0x3c0] sm:$0xff] }
  0x20   :  { %498 = vmatprep.subr.mxu0 %v16_v59  ;;  %568 = vmatpush1.msra.mxu1 %v180_v60  ;;  %v301_v26 = vld [vmem:[%s2596_s1 + $0x8f0] sm:$0xff]  ;;  %v296_v30 = vld [vmem:[%s2596_s1 + $0x8c8] sm:$0xff]  ;;  %v131_v31 = vld [vmem:[%s2596_s1 + $0x3a0] sm:$0xff]  ;;  %v419_v59 = vsub.s32 0, %v1628_v44 }
  0x21   :  { %499 = vmatpush1.msra.mxu0 %v15_v61  ;;  %569 = vmatprep.subr.mxu1 %v176_v62  ;;  %v295_v32 = vld [vmem:[%s2596_s1 + $0x8c0] sm:$0xff]  ;;  %v130_v33 = vld [vmem:[%s2596_s1 + $0x398] sm:$0xff]  ;;  %v125_v38 = vld [vmem:[%s2596_s1 + $0x370] sm:$0xff] }
  0x22   :  { %500 = vmatprep.subr.mxu0 %v171_v63  ;;  %570 = vmatpush1.msra.mxu1 %v175_v0  ;;  %v291_v34 = vld [vmem:[%s2596_s1 + $0x8a0] sm:$0xff]  ;;  %v126_v36 = vld [vmem:[%s2596_s1 + $0x378] sm:$0xff]  ;;  %v121_v40 = vld [vmem:[%s2596_s1 + $0x350] sm:$0xff] }
  0x23   :  { %501 = vmatpush2.msra.mxu0 %v170_v1  ;;  %571 = vmatprep.subr.mxu1 %v331_v2  ;;  %v290_v37 = vld [vmem:[%s2596_s1 + $0x898] sm:$0xff]  ;;  %v285_v41 = vld [vmem:[%s2596_s1 + $0x870] sm:$0xff]  ;;  %v120_v42 = vld [vmem:[%s2596_s1 + $0x348] sm:$0xff]  ;;  %v431_v1 = vsub.s32 3, %v1628_v44 }
  0x24   :  { %502 = vmatprep.subr.mxu0 %v166_v3  ;;  %572 = vmatpush2.msra.mxu1 %v330_v4  ;;  %v286_v39 = vld [vmem:[%s2596_s1 + $0x878] sm:$0xff]  ;;  %v281_v43 = vld [vmem:[%s2596_s1 + $0x850] sm:$0xff]  ;;  %v116_v45 = vld [vmem:[%s2596_s1 + $0x328] sm:$0xff]  ;;  %v427_v3 = vsub.s32 2, %v1628_v44 }
  0x25   :  { %503 = vmatpush2.msra.mxu0 %v165_v5  ;;  %573 = vmatprep.subr.mxu1 %v326_v6  ;;  %v280_v46 = vld [vmem:[%s2596_s1 + $0x848] sm:$0xff]  ;;  %v115_v47 = vld [vmem:[%s2596_s1 + $0x320] sm:$0xff]  ;;  %v110_v51 = vld [vmem:[%s2596_s1 + $0x2f8] sm:$0xff] }
  0x26   :  { %504 = vmatprep.subr.mxu0 %v161_v7  ;;  %574 = vmatpush2.msra.mxu1 %v325_v8  ;;  %v276_v48 = vld [vmem:[%s2596_s1 + $0x828] sm:$0xff]  ;;  %v111_v49 = vld [vmem:[%s2596_s1 + $0x300] sm:$0xff]  ;;  %v106_v54 = vld [vmem:[%s2596_s1 + $0x2d8] sm:$0xff] }
  0x27   :  { %505 = vmatpush2.msra.mxu0 %v160_v9  ;;  %575 = vmatprep.subr.mxu1 %v321_v10  ;;  %v275_v50 = vld [vmem:[%s2596_s1 + $0x820] sm:$0xff]  ;;  %v270_v55 = vld [vmem:[%s2596_s1 + $0x7f8] sm:$0xff]  ;;  %v105_v57 = vld [vmem:[%s2596_s1 + $0x2d0] sm:$0xff] }
  0x28   :  { %506 = vmatprep.subr.mxu0 %v156_v11  ;;  %576 = vmatpush2.msra.mxu1 %v320_v12  ;;  %v271_v52 = vld [vmem:[%s2596_s1 + $0x800] sm:$0xff]  ;;  %v266_v58 = vld [vmem:[%s2596_s1 + $0x7d8] sm:$0xff]  ;;  %v101_v60 = vld [vmem:[%s2596_s1 + $0x2b0] sm:$0xff] }
  0x29   :  { %507 = vmatpush2.msra.mxu0 %v155_v13  ;;  %577 = vmatprep.subr.mxu1 %v316_v14  ;;  %v1664_v56 = vld [vmem:[%s2597_s0] sm:$0x1f]  ;;  %v265_v61 = vld [vmem:[%s2596_s1 + $0x7d0] sm:$0xff]  ;;  %v100_v62 = vld [vmem:[%s2596_s1 + $0x2a8] sm:$0xff] }
  0x2a   :  { %508 = vmatprep.subr.mxu0 %v151_v15  ;;  %578 = vmatpush2.msra.mxu1 %v315_v16  ;;  %v261_v63 = vld [vmem:[%s2596_s1 + $0x7b0] sm:$0xff]  ;;  %v1688_v0 = vrot.slane %v1664_v56, %v423_v53  ;;  %v96_v2 = vld [vmem:[%s2596_s1 + $0x288] sm:$0xff]  ;;  %v95_v4 = vld [vmem:[%s2596_s1 + $0x280] sm:$0xff]  ;;  %v1704_v6 = vrot.slane %v1664_v56, %v419_v59  ;;  %v1719_v10 = vrot.slane %v1664_v56, %v431_v1 }
  0x2b   :  { %509 = vmatpush2.msra.mxu0 %v150_v17  ;;  %579 = vmatprep.subr.mxu1 %v311_v18  ;;  %v260_v5 = vld [vmem:[%s2596_s1 + $0x7a8] sm:$0xff]  ;;  %v411_v8 = vld [vmem:[%s2596_s1 + $0xc60] sm:$0xff]  ;;  %v410_v11 = vld [vmem:[%s2596_s1 + $0xc58] sm:$0xff]  ;;  %v1727_v12 = vrot.slane %v1664_v56, %v427_v3 }
  0x2c   :  { %510 = vmatprep.subr.mxu0 %v146_v19  ;;  %580 = vmatpush2.msra.mxu1 %v310_v20  ;;  %v256_v7 = vld [vmem:[%s2596_s1 + $0x788] sm:$0xff]  ;;  %v255_v9 = vld [vmem:[%s2596_s1 + $0x780] sm:$0xff]  ;;  %v406_v13 = vld [vmem:[%s2596_s1 + $0xc38] sm:$0xff] }
  0x2d   :  { %511 = vmatpush2.msra.mxu0 %v145_v21  ;;  %581 = vmatprep.subr.mxu1 %v306_v22  ;;  %v93_v14 = vld [vmem:[%s2596_s1 + $0x270] sm:$0xff]  ;;  %v92_v16 = vld [vmem:[%s2596_s1 + $0x268] sm:$0xff]  ;;  %v87_v20 = vld [vmem:[%s2596_s1 + $0x240] sm:$0xff] }
  0x2e   :  { %512 = vmatprep.subr.mxu0 %v141_v23  ;;  %582 = vmatpush2.msra.mxu1 %v305_v24  ;;  %v405_v15 = vld [vmem:[%s2596_s1 + $0xc30] sm:$0xff]  ;;  %v88_v18 = vld [vmem:[%s2596_s1 + $0x248] sm:$0xff]  ;;  %v83_v22 = vld [vmem:[%s2596_s1 + $0x220] sm:$0xff] }
  0x2f   :  { %513 = vmatpush2.msra.mxu0 %v140_v25  ;;  %583 = vmatprep.subr.mxu1 %v301_v26  ;;  %v401_v17 = vld [vmem:[%s2596_s1 + $0xc10] sm:$0xff]  ;;  %v400_v19 = vld [vmem:[%s2596_s1 + $0xc08] sm:$0xff]  ;;  %v395_v23 = vld [vmem:[%s2596_s1 + $0xbe0] sm:$0xff] }
  0x30   :  { %514 = vmatprep.subr.mxu0 %v136_v27  ;;  %584 = vmatpush2.msra.mxu1 %v300_v28  ;;  %v396_v21 = vld [vmem:[%s2596_s1 + $0xbe8] sm:$0xff]  ;;  %v82_v24 = vld [vmem:[%s2596_s1 + $0x218] sm:$0xff]  ;;  %v391_v25 = vld [vmem:[%s2596_s1 + $0xbc0] sm:$0xff] }
  0x31   :  { %515 = vmatpush2.msra.mxu0 %v135_v29  ;;  %585 = vmatprep.subr.mxu1 %v296_v30  ;;  %v78_v26 = vld [vmem:[%s2596_s1 + $0x1f8] sm:$0xff]  ;;  %v77_v28 = vld [vmem:[%s2596_s1 + $0x1f0] sm:$0xff] }
  0x32   :  { %516 = vmatprep.subr.mxu0 %v131_v31  ;;  %586 = vmatpush2.msra.mxu1 %v295_v32  ;;  %v390_v27 = vld [vmem:[%s2596_s1 + $0xbb8] sm:$0xff]  ;;  %v73_v30 = vld [vmem:[%s2596_s1 + $0x1d0] sm:$0xff]  ;;  %v72_v32 = vld [vmem:[%s2596_s1 + $0x1c8] sm:$0xff] }
  0x33   :  { %517 = vmatpush2.msra.mxu0 %v130_v33  ;;  %587 = vmatprep.subr.mxu1 %v291_v34  ;;  %v386_v29 = vld [vmem:[%s2596_s1 + $0xb98] sm:$0xff]  ;;  %v385_v31 = vld [vmem:[%s2596_s1 + $0xb90] sm:$0xff]  ;;  %v68_v34 = vld [vmem:[%s2596_s1 + $0x1a8] sm:$0xff] }
  0x34   :  { %518 = vmatprep.subr.mxu0 %v126_v36  ;;  %588 = vmatpush2.msra.mxu1 %v290_v37  ;;  %v381_v33 = vld [vmem:[%s2596_s1 + $0xb70] sm:$0xff]  ;;  %v380_v36 = vld [vmem:[%s2596_s1 + $0xb68] sm:$0xff]  ;;  %v67_v37 = vld [vmem:[%s2596_s1 + $0x1a0] sm:$0xff] }
  0x35   :  { %519 = vmatpush2.msra.mxu0 %v125_v38  ;;  %589 = vmatprep.subr.mxu1 %v286_v39  ;;  %v376_v38 = vld [vmem:[%s2596_s1 + $0xb48] sm:$0xff]  ;;  %v63_v39 = vld [vmem:[%s2596_s1 + $0x180] sm:$0xff] }
  0x36   :  { %520 = vmatprep.subr.mxu0 %v121_v40  ;;  %590 = vmatpush2.msra.mxu1 %v285_v41  ;;  %v375_v40 = vld [vmem:[%s2596_s1 + $0xb40] sm:$0xff]  ;;  %v62_v41 = vld [vmem:[%s2596_s1 + $0x178] sm:$0xff] }
  0x37   :  { %521 = vmatpush2.msra.mxu0 %v120_v42  ;;  %591 = vmatprep.subr.mxu1 %v281_v43  ;;  %v371_v42 = vld [vmem:[%s2596_s1 + $0xb20] sm:$0xff]  ;;  %v58_v43 = vld [vmem:[%s2596_s1 + $0x158] sm:$0xff] }
  0x38   :  { %522 = vmatprep.subr.mxu0 %v116_v45  ;;  %592 = vmatpush2.msra.mxu1 %v280_v46  ;;  %v370_v45 = vld [vmem:[%s2596_s1 + $0xb18] sm:$0xff]  ;;  %v57_v46 = vld [vmem:[%s2596_s1 + $0x150] sm:$0xff] }
  0x39   :  { %523 = vmatpush2.msra.mxu0 %v115_v47  ;;  %593 = vmatprep.subr.mxu1 %v276_v48  ;;  %v366_v47 = vld [vmem:[%s2596_s1 + $0xaf8] sm:$0xff]  ;;  %v53_v48 = vld [vmem:[%s2596_s1 + $0x130] sm:$0xff] }
  0x3a   :  { %524 = vmatprep.subr.mxu0 %v111_v49  ;;  %594 = vmatpush2.msra.mxu1 %v275_v50  ;;  %v365_v49 = vld [vmem:[%s2596_s1 + $0xaf0] sm:$0xff]  ;;  %v52_v50 = vld [vmem:[%s2596_s1 + $0x128] sm:$0xff] }
  0x3b   :  { %525 = vmatpush2.msra.mxu0 %v110_v51  ;;  %595 = vmatprep.subr.mxu1 %v271_v52  ;;  %v361_v51 = vld [vmem:[%s2596_s1 + $0xad0] sm:$0xff]  ;;  %v48_v52 = vld [vmem:[%s2596_s1 + $0x108] sm:$0xff] }
  0x3c   :  { %526 = vmatprep.subr.mxu0 %v106_v54  ;;  %596 = vmatpush2.msra.mxu1 %v270_v55  ;;  %v360_v54 = vld [vmem:[%s2596_s1 + $0xac8] sm:$0xff]  ;;  %v47_v55 = vld [vmem:[%s2596_s1 + $0x100] sm:$0xff] }
  0x3d   :  { %527 = vmatpush2.msra.mxu0 %v105_v57  ;;  %597 = vmatprep.subr.mxu1 %v266_v58  ;;  %v356_v57 = vld [vmem:[%s2596_s1 + $0xaa8] sm:$0xff]  ;;  %v43_v58 = vld [vmem:[%s2596_s1 + $0xe0] sm:$0xff] }
  0x3e   :  { %528 = vmatprep.subr.mxu0 %v101_v60  ;;  %598 = vmatpush2.msra.mxu1 %v265_v61  ;;  %v355_v60 = vld [vmem:[%s2596_s1 + $0xaa0] sm:$0xff]  ;;  %v42_v61 = vld [vmem:[%s2596_s1 + $0xd8] sm:$0xff] }
  0x3f   :  { %529 = vmatpush2.msra.mxu0 %v100_v62  ;;  %599 = vmatprep.subr.mxu1 %v261_v63  ;;  %v351_v62 = vld [vmem:[%s2596_s1 + $0xa80] sm:$0xff]  ;;  %v38_v63 = vld [vmem:[%s2596_s1 + $0xb8] sm:$0xff] }
  0x40   :  { %530 = vmatprep.subr.mxu0 %v96_v2  ;;  %532 = vmatprep.mubr.f32.mxu0 %v1688_v0  ;;  %v350_v2 = vld [vmem:[%s2596_s1 + $0xa78] sm:$0xff] }
  0x41   :  { %531 = vmatpush2.msra.mxu0 %v95_v4  ;;  %600 = vmatpush2.msra.mxu1 %v260_v5  ;;  %v37_v4 = vld [vmem:[%s2596_s1 + $0xb0] sm:$0xff]  ;;  %v346_v5 = vld [vmem:[%s2596_s1 + $0xa58] sm:$0xff] }
  0x42   :  { %533 = vmatmul.mubr.f32.vlgmr.msra.gmra.mxu0 %v1704_v6  ;;  %601 = vmatprep.subr.mxu1 %v256_v7  ;;  %v33_v7 = vld [vmem:[%s2596_s1 + $0x90] sm:$0xff] }
  0x43   :  { %610 = vmatprep.subr.mxu0 %v411_v8  ;;  %602 = vmatpush2.msra.mxu1 %v255_v9  ;;  %v345_v8 = vld [vmem:[%s2596_s1 + $0xa50] sm:$0xff]  ;;  %v32_v9 = vld [vmem:[%s2596_s1 + $0x88] sm:$0xff] }
  0x44   :  { %603 = vmatprep.mubr.f32.mxu1 %v1719_v10  ;;  %611 = vmatpush1.msra.mxu0 %v410_v11  ;;  %v341_v11 = vld [vmem:[%s2596_s1 + $0xa30] sm:$0xff] }
  0x45   :  { %604 = vmatmul.mubr.f32.vlgmr.msra.gmra.mxu1 %v1727_v12  ;;  %612 = vmatprep.subr.mxu0 %v406_v13  ;;  %v435_v13 = vsub.s32 4, %v1628_v44 }
  0x46   :  { %681 = vmatprep.subr.mxu1 %v93_v14  ;;  %613 = vmatpush1.msra.mxu0 %v405_v15  ;;  %v28_v14 = vld [vmem:[%s2596_s1 + $0x68] sm:$0xff] }
  0x47   :  { %682 = vmatpush1.msra.mxu1 %v92_v16  ;;  %614 = vmatprep.subr.mxu0 %v401_v17  ;;  %v340_v15 = vld [vmem:[%s2596_s1 + $0xa28] sm:$0xff]  ;;  %v27_v16 = vld [vmem:[%s2596_s1 + $0x60] sm:$0xff] }
  0x48   :  { %683 = vmatprep.subr.mxu1 %v88_v18  ;;  %615 = vmatpush1.msra.mxu0 %v400_v19  ;;  %v336_v17 = vld [vmem:[%s2596_s1 + $0xa08] sm:$0xff]  ;;  %v23_v18 = vld [vmem:[%s2596_s1 + $0x40] sm:$0xff] }
  0x49   :  { %684 = vmatpush1.msra.mxu1 %v87_v20  ;;  %616 = vmatprep.subr.mxu0 %v396_v21  ;;  %v335_v19 = vld [vmem:[%s2596_s1 + $0xa00] sm:$0xff]  ;;  %v22_v20 = vld [vmem:[%s2596_s1 + $0x38] sm:$0xff]  ;;  %v1916_v21 = vrot.slane %v1664_v56, %v435_v13  ;;  %v252_v56 = vld [vmem:[%s2596_s1 + $0x768] sm:$0xff] }
  0x4a   :  { %685 = vmatprep.subr.mxu1 %v83_v22  ;;  %617 = vmatpush1.msra.mxu0 %v395_v23  ;;  %v18_v22 = vld [vmem:[%s2596_s1 + $0x18] sm:$0xff]  ;;  %v253_v23 = vld [vmem:[%s2596_s1 + $0x770] sm:$0xff] }
  0x4b   :  { %686 = vmatpush1.msra.mxu1 %v82_v24  ;;  %618 = vmatprep.subr.mxu0 %v391_v25  ;;  %v17_v24 = vld [vmem:[%s2596_s1 + $0x10] sm:$0xff]  ;;  %v1283_v25 = vmov 0.0  }
  0x4c   :  { %687 = vmatprep.subr.mxu1 %v78_v26  ;;  %619 = vmatpush1.msra.mxu0 %v390_v27  ;;  %v173_v26 = vld [vmem:[%s2596_s1 + $0x4f0] sm:$0xff]  ;;  %v248_v27 = vld [vmem:[%s2596_s1 + $0x748] sm:$0xff] }
  0x4d   :  { %688 = vmatpush1.msra.mxu1 %v77_v28  ;;  %620 = vmatprep.subr.mxu0 %v386_v29  ;;  %v172_v28 = vld [vmem:[%s2596_s1 + $0x4e8] sm:$0xff]  ;;  %v247_v29 = vld [vmem:[%s2596_s1 + $0x740] sm:$0xff] }
  0x4e   :  { %689 = vmatprep.subr.mxu1 %v73_v30  ;;  %621 = vmatpush1.msra.mxu0 %v385_v31  ;;  %v168_v30 = vld [vmem:[%s2596_s1 + $0x4c8] sm:$0xff]  ;;  %v243_v31 = vld [vmem:[%s2596_s1 + $0x720] sm:$0xff] }
  0x4f   :  { %690 = vmatpush1.msra.mxu1 %v72_v32  ;;  %622 = vmatprep.subr.mxu0 %v381_v33  ;;  %v167_v32 = vld [vmem:[%s2596_s1 + $0x4c0] sm:$0xff]  ;;  %v242_v33 = vld [vmem:[%s2596_s1 + $0x718] sm:$0xff] }
  0x50   :  { %691 = vmatprep.subr.mxu1 %v68_v34  ;;  %623 = vmatpush1.msra.mxu0 %v380_v36  ;;  %v163_v34 = vld [vmem:[%s2596_s1 + $0x4a0] sm:$0xff]  ;;  %v238_v36 = vld [vmem:[%s2596_s1 + $0x6f8] sm:$0xff] }
  0x51   :  { %692 = vmatpush1.msra.mxu1 %v67_v37  ;;  %624 = vmatprep.subr.mxu0 %v376_v38  ;;  %v162_v37 = vld [vmem:[%s2596_s1 + $0x498] sm:$0xff]  ;;  %v237_v38 = vld [vmem:[%s2596_s1 + $0x6f0] sm:$0xff] }
  0x52   :  { %693 = vmatprep.subr.mxu1 %v63_v39  ;;  %625 = vmatpush1.msra.mxu0 %v375_v40  ;;  %v158_v39 = vld [vmem:[%s2596_s1 + $0x478] sm:$0xff]  ;;  %v233_v40 = vld [vmem:[%s2596_s1 + $0x6d0] sm:$0xff] }
  0x53   :  { %694 = vmatpush1.msra.mxu1 %v62_v41  ;;  %626 = vmatprep.subr.mxu0 %v371_v42  ;;  %v157_v41 = vld [vmem:[%s2596_s1 + $0x470] sm:$0xff]  ;;  %v232_v42 = vld [vmem:[%s2596_s1 + $0x6c8] sm:$0xff] }
  0x54   :  { %695 = vmatprep.subr.mxu1 %v58_v43  ;;  %627 = vmatpush1.msra.mxu0 %v370_v45  ;;  %v153_v43 = vld [vmem:[%s2596_s1 + $0x450] sm:$0xff]  ;;  %v228_v45 = vld [vmem:[%s2596_s1 + $0x6a8] sm:$0xff] }
  0x55   :  { %696 = vmatpush1.msra.mxu1 %v57_v46  ;;  %628 = vmatprep.subr.mxu0 %v366_v47  ;;  %v152_v46 = vld [vmem:[%s2596_s1 + $0x448] sm:$0xff]  ;;  %v227_v47 = vld [vmem:[%s2596_s1 + $0x6a0] sm:$0xff] }
  0x56   :  { %697 = vmatprep.subr.mxu1 %v53_v48  ;;  %629 = vmatpush1.msra.mxu0 %v365_v49  ;;  %v148_v48 = vld [vmem:[%s2596_s1 + $0x428] sm:$0xff]  ;;  %v223_v49 = vld [vmem:[%s2596_s1 + $0x680] sm:$0xff] }
  0x57   :  { %698 = vmatpush1.msra.mxu1 %v52_v50  ;;  %630 = vmatprep.subr.mxu0 %v361_v51  ;;  %v147_v50 = vld [vmem:[%s2596_s1 + $0x420] sm:$0xff]  ;;  %v222_v51 = vld [vmem:[%s2596_s1 + $0x678] sm:$0xff] }
  0x58   :  { %699 = vmatprep.subr.mxu1 %v48_v52  ;;  %631 = vmatpush1.msra.mxu0 %v360_v54  ;;  %v143_v52 = vld [vmem:[%s2596_s1 + $0x400] sm:$0xff]  ;;  %v218_v54 = vld [vmem:[%s2596_s1 + $0x658] sm:$0xff] }
  0x59   :  { %700 = vmatpush1.msra.mxu1 %v47_v55  ;;  %632 = vmatprep.subr.mxu0 %v356_v57  ;;  %v142_v55 = vld [vmem:[%s2596_s1 + $0x3f8] sm:$0xff]  ;;  %v217_v57 = vld [vmem:[%s2596_s1 + $0x650] sm:$0xff] }
  0x5a   :  { %701 = vmatprep.subr.mxu1 %v43_v58  ;;  %633 = vmatpush1.msra.mxu0 %v355_v60  ;;  %v138_v58 = vld [vmem:[%s2596_s1 + $0x3d8] sm:$0xff]  ;;  %v213_v60 = vld [vmem:[%s2596_s1 + $0x630] sm:$0xff] }
  0x5b   :  { %702 = vmatpush1.msra.mxu1 %v42_v61  ;;  %634 = vmatprep.subr.mxu0 %v351_v62  ;;  %v137_v61 = vld [vmem:[%s2596_s1 + $0x3d0] sm:$0xff]  ;;  %v212_v62 = vld [vmem:[%s2596_s1 + $0x628] sm:$0xff] }
  0x5c   :  { %703 = vmatprep.subr.mxu1 %v38_v63  ;;  %635 = vmatpush1.msra.mxu0 %v350_v2  ;;  %v133_v63 = vld [vmem:[%s2596_s1 + $0x3b0] sm:$0xff]  ;;  %v208_v2 = vld [vmem:[%s2596_s1 + $0x608] sm:$0xff] }
  0x5d   :  { %704 = vmatpush1.msra.mxu1 %v37_v4  ;;  %636 = vmatprep.subr.mxu0 %v346_v5  ;;  %v132_v4 = vld [vmem:[%s2596_s1 + $0x3a8] sm:$0xff]  ;;  %v207_v5 = vld [vmem:[%s2596_s1 + $0x600] sm:$0xff] }
  0x5e   :  { %705 = vmatprep.subr.mxu1 %v33_v7  ;;  %637 = vmatpush1.msra.mxu0 %v345_v8  ;;  %v128_v7 = vld [vmem:[%s2596_s1 + $0x388] sm:$0xff]  ;;  %v203_v8 = vld [vmem:[%s2596_s1 + $0x5e0] sm:$0xff] }
  0x5f   :  { %706 = vmatpush1.msra.mxu1 %v32_v9  ;;  %638 = vmatprep.subr.mxu0 %v341_v11  ;;  %v127_v9 = vld [vmem:[%s2596_s1 + $0x380] sm:$0xff]  ;;  %v202_v11 = vld [vmem:[%s2596_s1 + $0x5d8] sm:$0xff] }
  0x60   :  { %707 = vmatprep.subr.mxu1 %v28_v14  ;;  %639 = vmatpush1.msra.mxu0 %v340_v15  ;;  %v123_v14 = vld [vmem:[%s2596_s1 + $0x360] sm:$0xff]  ;;  %v198_v15 = vld [vmem:[%s2596_s1 + $0x5b8] sm:$0xff] }
  0x61   :  { %708 = vmatpush1.msra.mxu1 %v27_v16  ;;  %640 = vmatprep.subr.mxu0 %v336_v17  ;;  %v122_v16 = vld [vmem:[%s2596_s1 + $0x358] sm:$0xff]  ;;  %v197_v17 = vld [vmem:[%s2596_s1 + $0x5b0] sm:$0xff] }
  0x62   :  { %709 = vmatprep.subr.mxu1 %v23_v18  ;;  %641 = vmatpush1.msra.mxu0 %v335_v19  ;;  %v118_v18 = vld [vmem:[%s2596_s1 + $0x338] sm:$0xff]  ;;  %v193_v19 = vld [vmem:[%s2596_s1 + $0x590] sm:$0xff] }
  0x63   :  { %674 = vmatprep.mubr.f32.mxu0 %v1283_v25  ;;  %710 = vmatpush1.msra.mxu1 %v22_v20  ;;  %v117_v20 = vld [vmem:[%s2596_s1 + $0x330] sm:$0xff] }
  0x64   :  { %675 = vmatmul.mubr.f32.vlgmr.msra.gmra.mxu0 %v1916_v21  ;;  %711 = vmatprep.subr.mxu1 %v18_v22  ;;  %v192_v22 = vld [vmem:[%s2596_s1 + $0x588] sm:$0xff] }
  0x65   :  { %752 = vmatprep.subr.mxu0 %v253_v23  ;;  %712 = vmatpush1.msra.mxu1 %v17_v24  ;;  %v113_v23 = vld [vmem:[%s2596_s1 + $0x310] sm:$0xff]  ;;  %v188_v24 = vld [vmem:[%s2596_s1 + $0x568] sm:$0xff] }
  0x66   :  { %753 = vmatpush1.msra.mxu0 %v252_v56  ;;  %713 = vmatprep.subr.mxu1 %v173_v26  ;;  %v112_v56 = vld [vmem:[%s2596_s1 + $0x308] sm:$0xff]  ;;  %v187_v26 = vld [vmem:[%s2596_s1 + $0x560] sm:$0xff] }
  0x67   :  { %754 = vmatprep.subr.mxu0 %v248_v27  ;;  %714 = vmatpush2.msra.mxu1 %v172_v28  ;;  %v108_v27 = vld [vmem:[%s2596_s1 + $0x2e8] sm:$0xff]  ;;  %v183_v28 = vld [vmem:[%s2596_s1 + $0x540] sm:$0xff] }
  0x68   :  { %755 = vmatpush1.msra.mxu0 %v247_v29  ;;  %715 = vmatprep.subr.mxu1 %v168_v30  ;;  %v107_v29 = vld [vmem:[%s2596_s1 + $0x2e0] sm:$0xff]  ;;  %v182_v30 = vld [vmem:[%s2596_s1 + $0x538] sm:$0xff] }
  0x69   :  { %756 = vmatprep.subr.mxu0 %v243_v31  ;;  %716 = vmatpush2.msra.mxu1 %v167_v32  ;;  %v103_v31 = vld [vmem:[%s2596_s1 + $0x2c0] sm:$0xff]  ;;  %v178_v32 = vld [vmem:[%s2596_s1 + $0x518] sm:$0xff] }
  0x6a   :  { %757 = vmatpush1.msra.mxu0 %v242_v33  ;;  %717 = vmatprep.subr.mxu1 %v163_v34  ;;  %v102_v33 = vld [vmem:[%s2596_s1 + $0x2b8] sm:$0xff]  ;;  %v177_v34 = vld [vmem:[%s2596_s1 + $0x510] sm:$0xff] }
  0x6b   :  { %758 = vmatprep.subr.mxu0 %v238_v36  ;;  %718 = vmatpush2.msra.mxu1 %v162_v37  ;;  %v98_v36 = vld [vmem:[%s2596_s1 + $0x298] sm:$0xff]  ;;  %v333_v37 = vld [vmem:[%s2596_s1 + $0x9f0] sm:$0xff] }
  0x6c   :  { %759 = vmatpush1.msra.mxu0 %v237_v38  ;;  %719 = vmatprep.subr.mxu1 %v158_v39  ;;  %v97_v38 = vld [vmem:[%s2596_s1 + $0x290] sm:$0xff]  ;;  %v332_v39 = vld [vmem:[%s2596_s1 + $0x9e8] sm:$0xff] }
  0x6d   :  { %760 = vmatprep.subr.mxu0 %v233_v40  ;;  %720 = vmatpush2.msra.mxu1 %v157_v41  ;;  %v328_v40 = vld [vmem:[%s2596_s1 + $0x9c8] sm:$0xff]  ;;  %v413_v41 = vld [vmem:[%s2596_s1 + $0xc70] sm:$0xff] }
  0x6e   :  { %761 = vmatpush1.msra.mxu0 %v232_v42  ;;  %721 = vmatprep.subr.mxu1 %v153_v43  ;;  %v327_v42 = vld [vmem:[%s2596_s1 + $0x9c0] sm:$0xff]  ;;  %v412_v43 = vld [vmem:[%s2596_s1 + $0xc68] sm:$0xff] }
  0x6f   :  { %762 = vmatprep.subr.mxu0 %v228_v45  ;;  %722 = vmatpush2.msra.mxu1 %v152_v46  ;;  %v323_v45 = vld [vmem:[%s2596_s1 + $0x9a0] sm:$0xff]  ;;  %v408_v46 = vld [vmem:[%s2596_s1 + $0xc48] sm:$0xff] }
  0x70   :  { %763 = vmatpush1.msra.mxu0 %v227_v47  ;;  %723 = vmatprep.subr.mxu1 %v148_v48  ;;  %v322_v47 = vld [vmem:[%s2596_s1 + $0x998] sm:$0xff]  ;;  %v407_v48 = vld [vmem:[%s2596_s1 + $0xc40] sm:$0xff] }
  0x71   :  { %764 = vmatprep.subr.mxu0 %v223_v49  ;;  %724 = vmatpush2.msra.mxu1 %v147_v50  ;;  %v318_v49 = vld [vmem:[%s2596_s1 + $0x978] sm:$0xff]  ;;  %v403_v50 = vld [vmem:[%s2596_s1 + $0xc20] sm:$0xff] }
  0x72   :  { %765 = vmatpush1.msra.mxu0 %v222_v51  ;;  %725 = vmatprep.subr.mxu1 %v143_v52  ;;  %v317_v51 = vld [vmem:[%s2596_s1 + $0x970] sm:$0xff]  ;;  %v402_v52 = vld [vmem:[%s2596_s1 + $0xc18] sm:$0xff] }
  0x73   :  { %766 = vmatprep.subr.mxu0 %v218_v54  ;;  %726 = vmatpush2.msra.mxu1 %v142_v55  ;;  %v313_v54 = vld [vmem:[%s2596_s1 + $0x950] sm:$0xff]  ;;  %v398_v55 = vld [vmem:[%s2596_s1 + $0xbf8] sm:$0xff] }
  0x74   :  { %767 = vmatpush1.msra.mxu0 %v217_v57  ;;  %727 = vmatprep.subr.mxu1 %v138_v58  ;;  %v312_v57 = vld [vmem:[%s2596_s1 + $0x948] sm:$0xff]  ;;  %v397_v58 = vld [vmem:[%s2596_s1 + $0xbf0] sm:$0xff] }
  0x75   :  { %768 = vmatprep.subr.mxu0 %v213_v60  ;;  %728 = vmatpush2.msra.mxu1 %v137_v61  ;;  %v308_v60 = vld [vmem:[%s2596_s1 + $0x928] sm:$0xff]  ;;  %v393_v61 = vld [vmem:[%s2596_s1 + $0xbd0] sm:$0xff] }
  0x76   :  { %769 = vmatpush1.msra.mxu0 %v212_v62  ;;  %729 = vmatprep.subr.mxu1 %v133_v63  ;;  %v307_v62 = vld [vmem:[%s2596_s1 + $0x920] sm:$0xff]  ;;  %v392_v63 = vld [vmem:[%s2596_s1 + $0xbc8] sm:$0xff] }
  0x77   :  { %770 = vmatprep.subr.mxu0 %v208_v2  ;;  %730 = vmatpush2.msra.mxu1 %v132_v4  ;;  %v303_v2 = vld [vmem:[%s2596_s1 + $0x900] sm:$0xff]  ;;  %v388_v4 = vld [vmem:[%s2596_s1 + $0xba8] sm:$0xff] }
  0x78   :  { %771 = vmatpush1.msra.mxu0 %v207_v5  ;;  %731 = vmatprep.subr.mxu1 %v128_v7  ;;  %v302_v5 = vld [vmem:[%s2596_s1 + $0x8f8] sm:$0xff]  ;;  %v387_v7 = vld [vmem:[%s2596_s1 + $0xba0] sm:$0xff] }
  0x79   :  { %772 = vmatprep.subr.mxu0 %v203_v8  ;;  %732 = vmatpush2.msra.mxu1 %v127_v9  ;;  %v298_v8 = vld [vmem:[%s2596_s1 + $0x8d8] sm:$0xff]  ;;  %v383_v9 = vld [vmem:[%s2596_s1 + $0xb80] sm:$0xff] }
  0x7a   :  { %773 = vmatpush1.msra.mxu0 %v202_v11  ;;  %733 = vmatprep.subr.mxu1 %v123_v14  ;;  %v297_v11 = vld [vmem:[%s2596_s1 + $0x8d0] sm:$0xff]  ;;  %v382_v14 = vld [vmem:[%s2596_s1 + $0xb78] sm:$0xff] }
  0x7b   :  { %774 = vmatprep.subr.mxu0 %v198_v15  ;;  %734 = vmatpush2.msra.mxu1 %v122_v16  ;;  %v293_v15 = vld [vmem:[%s2596_s1 + $0x8b0] sm:$0xff]  ;;  %v378_v16 = vld [vmem:[%s2596_s1 + $0xb58] sm:$0xff] }
  0x7c   :  { %775 = vmatpush1.msra.mxu0 %v197_v17  ;;  %735 = vmatprep.subr.mxu1 %v118_v18  ;;  %v292_v17 = vld [vmem:[%s2596_s1 + $0x8a8] sm:$0xff]  ;;  %v377_v18 = vld [vmem:[%s2596_s1 + $0xb50] sm:$0xff] }
  0x7d   :  { %776 = vmatprep.subr.mxu0 %v193_v19  ;;  %736 = vmatpush2.msra.mxu1 %v117_v20  ;;  %v288_v19 = vld [vmem:[%s2596_s1 + $0x888] sm:$0xff]  ;;  %v373_v20 = vld [vmem:[%s2596_s1 + $0xb30] sm:$0xff] }
  0x7e   :  { %777 = vmatpush1.msra.mxu0 %v192_v22  ;;  %737 = vmatprep.subr.mxu1 %v113_v23  ;;  %v287_v22 = vld [vmem:[%s2596_s1 + $0x880] sm:$0xff]  ;;  %v372_v23 = vld [vmem:[%s2596_s1 + $0xb28] sm:$0xff] }
  0x7f   :  { %778 = vmatprep.subr.mxu0 %v188_v24  ;;  %738 = vmatpush2.msra.mxu1 %v112_v56  ;;  %v283_v24 = vld [vmem:[%s2596_s1 + $0x860] sm:$0xff]  ;;  %v368_v56 = vld [vmem:[%s2596_s1 + $0xb08] sm:$0xff] }
  0x80   :  { %779 = vmatpush1.msra.mxu0 %v187_v26  ;;  %739 = vmatprep.subr.mxu1 %v108_v27  ;;  %v282_v26 = vld [vmem:[%s2596_s1 + $0x858] sm:$0xff]  ;;  %v367_v27 = vld [vmem:[%s2596_s1 + $0xb00] sm:$0xff] }
  0x81   :  { %780 = vmatprep.subr.mxu0 %v183_v28  ;;  %740 = vmatpush2.msra.mxu1 %v107_v29  ;;  %v278_v28 = vld [vmem:[%s2596_s1 + $0x838] sm:$0xff]  ;;  %v363_v29 = vld [vmem:[%s2596_s1 + $0xae0] sm:$0xff] }
  0x82   :  { %781 = vmatpush1.msra.mxu0 %v182_v30  ;;  %741 = vmatprep.subr.mxu1 %v103_v31  ;;  %v277_v30 = vld [vmem:[%s2596_s1 + $0x830] sm:$0xff]  ;;  %v362_v31 = vld [vmem:[%s2596_s1 + $0xad8] sm:$0xff] }
  0x83   :  { %782 = vmatprep.subr.mxu0 %v178_v32  ;;  %742 = vmatpush2.msra.mxu1 %v102_v33  ;;  %v273_v32 = vld [vmem:[%s2596_s1 + $0x810] sm:$0xff]  ;;  %v358_v33 = vld [vmem:[%s2596_s1 + $0xab8] sm:$0xff] }
  0x84   :  { %783 = vmatpush1.msra.mxu0 %v177_v34  ;;  %743 = vmatprep.subr.mxu1 %v98_v36  ;;  %v272_v34 = vld [vmem:[%s2596_s1 + $0x808] sm:$0xff]  ;;  %v357_v36 = vld [vmem:[%s2596_s1 + $0xab0] sm:$0xff] }
  0x85   :  { %784 = vmatprep.subr.mxu0 %v333_v37  ;;  %744 = vmatpush2.msra.mxu1 %v97_v38  ;;  %v268_v37 = vld [vmem:[%s2596_s1 + $0x7e8] sm:$0xff]  ;;  %v353_v38 = vld [vmem:[%s2596_s1 + $0xa90] sm:$0xff] }
  0x86   :  { %785 = vmatpush2.msra.mxu0 %v332_v39  ;;  %745 = vmatprep.mubr.f32.mxu1 %v1688_v0  ;;  %v267_v39 = vld [vmem:[%s2596_s1 + $0x7e0] sm:$0xff] }
  0x87   :  { %786 = vmatprep.subr.mxu0 %v328_v40  ;;  %823 = vmatprep.subr.mxu1 %v413_v41  ;;  %v352_v40 = vld [vmem:[%s2596_s1 + $0xa88] sm:$0xff]  ;;  %v263_v41 = vld [vmem:[%s2596_s1 + $0x7c0] sm:$0xff] }
  0x88   :  { %746 = vmatmul.mubr.f32.vlgmr.msra.gmra.mxu1 %v1704_v6  ;;  %787 = vmatpush2.msra.mxu0 %v327_v42  ;;  %v348_v42 = vld [vmem:[%s2596_s1 + $0xa68] sm:$0xff] }
  0x89   :  { %824 = vmatpush1.msra.mxu1 %v412_v43  ;;  %788 = vmatprep.subr.mxu0 %v323_v45  ;;  %v262_v43 = vld [vmem:[%s2596_s1 + $0x7b8] sm:$0xff]  ;;  %v347_v45 = vld [vmem:[%s2596_s1 + $0xa60] sm:$0xff] }
  0x8a   :  { %825 = vmatprep.subr.mxu1 %v408_v46  ;;  %789 = vmatpush2.msra.mxu0 %v322_v47  ;;  %v258_v46 = vld [vmem:[%s2596_s1 + $0x798] sm:$0xff]  ;;  %v343_v47 = vld [vmem:[%s2596_s1 + $0xa40] sm:$0xff] }
  0x8b   :  { %826 = vmatpush1.msra.mxu1 %v407_v48  ;;  %790 = vmatprep.subr.mxu0 %v318_v49  ;;  %v257_v48 = vld [vmem:[%s2596_s1 + $0x790] sm:$0xff]  ;;  %v342_v49 = vld [vmem:[%s2596_s1 + $0xa38] sm:$0xff] }
  0x8c   :  { %827 = vmatprep.subr.mxu1 %v403_v50  ;;  %791 = vmatpush2.msra.mxu0 %v317_v51  ;;  %v338_v50 = vld [vmem:[%s2596_s1 + $0xa18] sm:$0xff] }
  0x8d   :  { %828 = vmatpush1.msra.mxu1 %v402_v52  ;;  %792 = vmatprep.subr.mxu0 %v313_v54  ;;  %v174_v51 = vld [vmem:[%s2596_s1 + $0x4f8] sm:$0xff]  ;;  %v337_v52 = vld [vmem:[%s2596_s1 + $0xa10] sm:$0xff] }
  0x8e   :  { %829 = vmatprep.subr.mxu1 %v398_v55  ;;  %793 = vmatpush2.msra.mxu0 %v312_v57  ;;  %v94_v54 = vld [vmem:[%s2596_s1 + $0x278] sm:$0xff]  ;;  %v169_v55 = vld [vmem:[%s2596_s1 + $0x4d0] sm:$0xff] }
  0x8f   :  { %830 = vmatpush1.msra.mxu1 %v397_v58  ;;  %794 = vmatprep.subr.mxu0 %v308_v60  ;;  %v334_v57 = vld [vmem:[%s2596_s1 + $0x9f8] sm:$0xff]  ;;  %v89_v58 = vld [vmem:[%s2596_s1 + $0x250] sm:$0xff] }
  0x90   :  { %831 = vmatprep.subr.mxu1 %v393_v61  ;;  %795 = vmatpush2.msra.mxu0 %v307_v62  ;;  %v254_v60 = vld [vmem:[%s2596_s1 + $0x778] sm:$0xff]  ;;  %v164_v61 = vld [vmem:[%s2596_s1 + $0x4a8] sm:$0xff]  ;;  %v329_v62 = vld [vmem:[%s2596_s1 + $0x9d0] sm:$0xff] }
  0x91   :  { %832 = vmatpush1.msra.mxu1 %v392_v63  ;;  %796 = vmatprep.subr.mxu0 %v303_v2  ;;  %v84_v63 = vld [vmem:[%s2596_s1 + $0x228] sm:$0xff]  ;;  %v249_v2 = vld [vmem:[%s2596_s1 + $0x750] sm:$0xff] }
  0x92   :  { %833 = vmatprep.subr.mxu1 %v388_v4  ;;  %797 = vmatpush2.msra.mxu0 %v302_v5  ;;  %v159_v4 = vld [vmem:[%s2596_s1 + $0x480] sm:$0xff]  ;;  %v324_v5 = vld [vmem:[%s2596_s1 + $0x9a8] sm:$0xff] }
  0x93   :  { %834 = vmatpush1.msra.mxu1 %v387_v7  ;;  %798 = vmatprep.subr.mxu0 %v298_v8  ;;  %v79_v7 = vld [vmem:[%s2596_s1 + $0x200] sm:$0xff]  ;;  %v244_v8 = vld [vmem:[%s2596_s1 + $0x728] sm:$0xff] }
  0x94   :  { %835 = vmatprep.subr.mxu1 %v383_v9  ;;  %799 = vmatpush2.msra.mxu0 %v297_v11  ;;  %v154_v9 = vld [vmem:[%s2596_s1 + $0x458] sm:$0xff]  ;;  %v319_v11 = vld [vmem:[%s2596_s1 + $0x980] sm:$0xff] }
  0x95   :  { %836 = vmatpush1.msra.mxu1 %v382_v14  ;;  %800 = vmatprep.subr.mxu0 %v293_v15  ;;  %v74_v14 = vld [vmem:[%s2596_s1 + $0x1d8] sm:$0xff]  ;;  %v239_v15 = vld [vmem:[%s2596_s1 + $0x700] sm:$0xff] }
  0x96   :  { %837 = vmatprep.subr.mxu1 %v378_v16  ;;  %801 = vmatpush2.msra.mxu0 %v292_v17  ;;  %v149_v16 = vld [vmem:[%s2596_s1 + $0x430] sm:$0xff]  ;;  %v314_v17 = vld [vmem:[%s2596_s1 + $0x958] sm:$0xff] }
  0x97   :  { %838 = vmatpush1.msra.mxu1 %v377_v18  ;;  %802 = vmatprep.subr.mxu0 %v288_v19  ;;  %v69_v18 = vld [vmem:[%s2596_s1 + $0x1b0] sm:$0xff]  ;;  %v234_v19 = vld [vmem:[%s2596_s1 + $0x6d8] sm:$0xff] }
  0x98   :  { %839 = vmatprep.subr.mxu1 %v373_v20  ;;  %803 = vmatpush2.msra.mxu0 %v287_v22  ;;  %v144_v20 = vld [vmem:[%s2596_s1 + $0x408] sm:$0xff]  ;;  %v309_v22 = vld [vmem:[%s2596_s1 + $0x930] sm:$0xff] }
  0x99   :  { %840 = vmatpush1.msra.mxu1 %v372_v23  ;;  %804 = vmatprep.subr.mxu0 %v283_v24  ;;  %v64_v23 = vld [vmem:[%s2596_s1 + $0x188] sm:$0xff]  ;;  %v229_v24 = vld [vmem:[%s2596_s1 + $0x6b0] sm:$0xff] }
  0x9a   :  { %841 = vmatprep.subr.mxu1 %v368_v56  ;;  %805 = vmatpush2.msra.mxu0 %v282_v26  ;;  %v139_v56 = vld [vmem:[%s2596_s1 + $0x3e0] sm:$0xff]  ;;  %v304_v26 = vld [vmem:[%s2596_s1 + $0x908] sm:$0xff] }
  0x9b   :  { %842 = vmatpush1.msra.mxu1 %v367_v27  ;;  %806 = vmatprep.subr.mxu0 %v278_v28  ;;  %v59_v27 = vld [vmem:[%s2596_s1 + $0x160] sm:$0xff]  ;;  %v224_v28 = vld [vmem:[%s2596_s1 + $0x688] sm:$0xff] }
  0x9c   :  { %843 = vmatprep.subr.mxu1 %v363_v29  ;;  %807 = vmatpush2.msra.mxu0 %v277_v30  ;;  %v134_v29 = vld [vmem:[%s2596_s1 + $0x3b8] sm:$0xff]  ;;  %v299_v30 = vld [vmem:[%s2596_s1 + $0x8e0] sm:$0xff] }
  0x9d   :  { %844 = vmatpush1.msra.mxu1 %v362_v31  ;;  %808 = vmatprep.subr.mxu0 %v273_v32  ;;  %v54_v31 = vld [vmem:[%s2596_s1 + $0x138] sm:$0xff]  ;;  %v219_v32 = vld [vmem:[%s2596_s1 + $0x660] sm:$0xff] }
  0x9e   :  { %845 = vmatprep.subr.mxu1 %v358_v33  ;;  %809 = vmatpush2.msra.mxu0 %v272_v34  ;;  %v129_v33 = vld [vmem:[%s2596_s1 + $0x390] sm:$0xff]  ;;  %v294_v34 = vld [vmem:[%s2596_s1 + $0x8b8] sm:$0xff] }
  0x9f   :  { %846 = vmatpush1.msra.mxu1 %v357_v36  ;;  %810 = vmatprep.subr.mxu0 %v268_v37  ;;  %v49_v36 = vld [vmem:[%s2596_s1 + $0x110] sm:$0xff]  ;;  %v214_v37 = vld [vmem:[%s2596_s1 + $0x638] sm:$0xff] }
  0xa0   :  { %847 = vmatprep.subr.mxu1 %v353_v38  ;;  %811 = vmatpush2.msra.mxu0 %v267_v39  ;;  %v124_v38 = vld [vmem:[%s2596_s1 + $0x368] sm:$0xff]  ;;  %v289_v39 = vld [vmem:[%s2596_s1 + $0x890] sm:$0xff] }
  0xa1   :  { %848 = vmatpush1.msra.mxu1 %v352_v40  ;;  %812 = vmatprep.subr.mxu0 %v263_v41  ;;  %v44_v40 = vld [vmem:[%s2596_s1 + $0xe8] sm:$0xff]  ;;  %v209_v41 = vld [vmem:[%s2596_s1 + $0x610] sm:$0xff] }
  0xa2   :  { %849 = vmatprep.subr.mxu1 %v348_v42  ;;  %813 = vmatpush2.msra.mxu0 %v262_v43  ;;  %v119_v42 = vld [vmem:[%s2596_s1 + $0x340] sm:$0xff]  ;;  %v284_v43 = vld [vmem:[%s2596_s1 + $0x868] sm:$0xff] }
  0xa3   :  { %850 = vmatpush1.msra.mxu1 %v347_v45  ;;  %814 = vmatprep.subr.mxu0 %v258_v46  ;;  %v39_v45 = vld [vmem:[%s2596_s1 + $0xc0] sm:$0xff]  ;;  %v204_v46 = vld [vmem:[%s2596_s1 + $0x5e8] sm:$0xff] }
  0xa4   :  { %851 = vmatprep.subr.mxu1 %v343_v47  ;;  %815 = vmatpush2.msra.mxu0 %v257_v48  ;;  %v114_v47 = vld [vmem:[%s2596_s1 + $0x318] sm:$0xff]  ;;  %v279_v48 = vld [vmem:[%s2596_s1 + $0x840] sm:$0xff] }
  0xa5   :  { %816 = vmatprep.mubr.f32.mxu0 %v1719_v10  ;;  %852 = vmatpush1.msra.mxu1 %v342_v49  ;;  %v34_v49 = vld [vmem:[%s2596_s1 + $0x98] sm:$0xff] }
  0xa6   :  { %817 = vmatmul.mubr.f32.vlgmr.msra.gmra.mxu0 %v1727_v12  ;;  %853 = vmatprep.subr.mxu1 %v338_v50  ;;  %v199_v50 = vld [vmem:[%s2596_s1 + $0x5c0] sm:$0xff] }
  0xa7   :  { %1158 = vmatprep.subr.mxu0 %v174_v51  ;;  %854 = vmatpush1.msra.mxu1 %v337_v52  ;;  %v109_v51 = vld [vmem:[%s2596_s1 + $0x2f0] sm:$0xff]  ;;  %v274_v52 = vld [vmem:[%s2596_s1 + $0x818] sm:$0xff] }
  0xa8   :  { %887 = vmatprep.mubr.f32.mxu1 %v1283_v25  ;;  %1159 = vmatpush3.msra.mxu0 %v94_v54  ;;  %v29_v54 = vld [vmem:[%s2596_s1 + $0x70] sm:$0xff] }
  0xa9   :  { %888 = vmatmul.mubr.f32.vlgmr.msra.gmra.mxu1 %v1916_v21  ;;  %1160 = vmatprep.subr.mxu0 %v169_v55  ;;  %v194_v55 = vld [vmem:[%s2596_s1 + $0x598] sm:$0xff] }
  0xaa   :  { %1193 = vmatprep.subr.mxu1 %v334_v57  ;;  %1161 = vmatpush3.msra.mxu0 %v89_v58  ;;  %v104_v57 = vld [vmem:[%s2596_s1 + $0x2c8] sm:$0xff]  ;;  %v269_v58 = vld [vmem:[%s2596_s1 + $0x7f0] sm:$0xff] }
  0xab   :  { %1194 = vmatpush3.msra.mxu1 %v254_v60  ;;  %1162 = vmatprep.subr.mxu0 %v164_v61  ;;  %v24_v60 = vld [vmem:[%s2596_s1 + $0x48] sm:$0xff]  ;;  %v189_v61 = vld [vmem:[%s2596_s1 + $0x570] sm:$0xff] }
  0xac   :  { %1195 = vmatprep.subr.mxu1 %v329_v62  ;;  %1163 = vmatpush3.msra.mxu0 %v84_v63  ;;  %v99_v62 = vld [vmem:[%s2596_s1 + $0x2a0] sm:$0xff]  ;;  %v264_v63 = vld [vmem:[%s2596_s1 + $0x7c8] sm:$0xff] }
  0xad   :  { %1196 = vmatpush3.msra.mxu1 %v249_v2  ;;  %1164 = vmatprep.subr.mxu0 %v159_v4  ;;  %v19_v2 = vld [vmem:[%s2596_s1 + $0x20] sm:$0xff]  ;;  %v184_v4 = vld [vmem:[%s2596_s1 + $0x548] sm:$0xff] }
  0xae   :  { %1197 = vmatprep.subr.mxu1 %v324_v5  ;;  %1165 = vmatpush3.msra.mxu0 %v79_v7  ;;  %v259_v5 = vld [vmem:[%s2596_s1 + $0x7a0] sm:$0xff] }
  0xaf   :  { %1198 = vmatpush3.msra.mxu1 %v244_v8  ;;  %1166 = vmatprep.subr.mxu0 %v154_v9  ;;  %v179_v7 = vld [vmem:[%s2596_s1 + $0x520] sm:$0xff]  ;;  %v414_v8 = vld [vmem:[%s2596_s1 + $0xc78] sm:$0xff]  ;;  %v409_v9 = vld [vmem:[%s2596_s1 + $0xc50] sm:$0xff] }
  0xb0   :  { %1199 = vmatprep.subr.mxu1 %v319_v11  ;;  %1167 = vmatpush3.msra.mxu0 %v74_v14  ;;  %v384_v11 = vld [vmem:[%s2596_s1 + $0xb88] sm:$0xff]  ;;  %v379_v14 = vld [vmem:[%s2596_s1 + $0xb60] sm:$0xff] }
  0xb1   :  { %1200 = vmatpush3.msra.mxu1 %v239_v15  ;;  %1168 = vmatprep.subr.mxu0 %v149_v16  ;;  %v374_v15 = vld [vmem:[%s2596_s1 + $0xb38] sm:$0xff]  ;;  %v369_v16 = vld [vmem:[%s2596_s1 + $0xb10] sm:$0xff] }
  0xb2   :  { %1201 = vmatprep.subr.mxu1 %v314_v17  ;;  %1169 = vmatpush3.msra.mxu0 %v69_v18  ;;  %v364_v17 = vld [vmem:[%s2596_s1 + $0xae8] sm:$0xff]  ;;  %v359_v18 = vld [vmem:[%s2596_s1 + $0xac0] sm:$0xff] }
  0xb3   :  { %1202 = vmatpush3.msra.mxu1 %v234_v19  ;;  %1170 = vmatprep.subr.mxu0 %v144_v20  ;;  %v354_v19 = vld [vmem:[%s2596_s1 + $0xa98] sm:$0xff]  ;;  %v349_v20 = vld [vmem:[%s2596_s1 + $0xa70] sm:$0xff] }
  0xb4   :  { %1203 = vmatprep.subr.mxu1 %v309_v22  ;;  %1171 = vmatpush3.msra.mxu0 %v64_v23  ;;  %v344_v22 = vld [vmem:[%s2596_s1 + $0xa48] sm:$0xff]  ;;  %v339_v23 = vld [vmem:[%s2596_s1 + $0xa20] sm:$0xff] }
  0xb5   :  { %1204 = vmatpush3.msra.mxu1 %v229_v24  ;;  %1172 = vmatprep.subr.mxu0 %v139_v56 }
  0xb6   :  { %1205 = vmatprep.subr.mxu1 %v304_v26  ;;  %1173 = vmatpush3.msra.mxu0 %v59_v27 }
  0xb7   :  { %1206 = vmatpush3.msra.mxu1 %v224_v28  ;;  %1174 = vmatprep.subr.mxu0 %v134_v29 }
  0xb8   :  { %1207 = vmatprep.subr.mxu1 %v299_v30  ;;  %1175 = vmatpush3.msra.mxu0 %v54_v31  ;;  %v415_v31 = vld [vmem:[%s2598_s2] sm:$0x1f] }
  0xb9   :  { %1208 = vmatpush3.msra.mxu1 %v219_v32  ;;  %1176 = vmatprep.subr.mxu0 %v129_v33  ;;  %v458_v33 = vrot.slane %v415_v31, %v431_v1 }
  0xba   :  { %1209 = vmatprep.subr.mxu1 %v294_v34  ;;  %1177 = vmatpush3.msra.mxu0 %v49_v36  ;;  %v446_v36 = vrot.slane %v415_v31, %v419_v59 }
  0xbb   :  { %1210 = vmatpush3.msra.mxu1 %v214_v37  ;;  %1178 = vmatprep.subr.mxu0 %v124_v38 }
  0xbc   :  { %1211 = vmatprep.subr.mxu1 %v289_v39  ;;  %1179 = vmatpush3.msra.mxu0 %v44_v40 }
  0xbd   :  { %1212 = vmatpush3.msra.mxu1 %v209_v41  ;;  %1180 = vmatprep.subr.mxu0 %v119_v42 }
  0xbe   :  { %1213 = vmatprep.subr.mxu1 %v284_v43  ;;  %1181 = vmatpush3.msra.mxu0 %v39_v45 }
  0xbf   :  { %1214 = vmatpush3.msra.mxu1 %v204_v46  ;;  %1182 = vmatprep.subr.mxu0 %v114_v47  ;;  %v1285_v46 = vmov 1966171168  }
  0xc0   :  { %1215 = vmatprep.subr.mxu1 %v279_v48  ;;  %1183 = vmatpush3.msra.mxu0 %v34_v49  ;;  %v1112_v1 = vunpack.c.l.s4 %v1285_v46 }
  0xc1   :  { %1216 = vmatpush3.msra.mxu1 %v199_v50  ;;  %1184 = vmatprep.subr.mxu0 %v109_v51 }
  0xc2   :  { %1217 = vmatprep.subr.mxu1 %v274_v52  ;;  %1185 = vmatpush3.msra.mxu0 %v29_v54  ;;  %v1113_v52 = vunpack.c.0.s8 %v1112_v1 }
  0xc3   :  { %1218 = vmatpush3.msra.mxu1 %v194_v55  ;;  %1186 = vmatprep.subr.mxu0 %v104_v57  ;;  %v462_v55 = vrot.slane %v415_v31, %v435_v13 }
  0xc4   :  { %1219 = vmatprep.subr.mxu1 %v269_v58  ;;  %1187 = vmatpush3.msra.mxu0 %v24_v60 }
  0xc5   :  { %1220 = vmatpush3.msra.mxu1 %v189_v61  ;;  %1188 = vmatprep.subr.mxu0 %v99_v62 }
  0xc6   :  { %1221 = vmatprep.subr.mxu1 %v264_v63  ;;  %1189 = vmatpush3.msra.mxu0 %v19_v2  ;;  %v1116_v63 = vsub.s32 %v1113_v52, %v1628_v44 }
  0xc7   :  { %958 = vmatprep.mubr.f32.mxu0 %v1688_v0  ;;  %1222 = vmatpush3.msra.mxu1 %v184_v4  ;;  %v404_v0 = vld [vmem:[%s2596_s1 + $0xc28] sm:$0xff] }
  0xc8   :  { %959 = vmatmul.mubr.f32.vlgmr.msra.gmra.mxu0 %v1704_v6  ;;  %1223 = vmatprep.subr.mxu1 %v259_v5  ;;  %v399_v6 = vld [vmem:[%s2596_s1 + $0xc00] sm:$0xff] }
  0xc9   :  { %1245 = vmatprep.subr.mxu0 %v1283_v25  ;;  %1224 = vmatpush3.msra.mxu1 %v179_v7 }
  0xca   :  { %1028 = vmatprep.mubr.f32.mxu1 %v1719_v10  ;;  %1246 = vmatpush3.msra.mxu0 %v414_v8  ;;  %v394_v10 = vld [vmem:[%s2596_s1 + $0xbd8] sm:$0xff] }
  0xcb   :  { %1029 = vmatmul.mubr.f32.vlgmr.msra.gmra.mxu1 %v1727_v12  ;;  %1247 = vmatprep.subr.mxu0 %v1283_v25  ;;  %v389_v12 = vld [vmem:[%s2596_s1 + $0xbb0] sm:$0xff] }
  0xcc   :  { %1248 = vmatpush3.msra.mxu0 %v409_v9  ;;  %1277 = vmatprep.mubr.msk.f32.mxu0 %vm1284_vm0, %v1283_v25 }
  0xcd   :  { %1249 = vmatprep.subr.mxu0 %v1283_v25 }
  0xce   :  { %1250 = vmatpush3.msra.mxu0 %v404_v0 }
  0xcf   :  { %1251 = vmatprep.subr.mxu0 %v1283_v25 }
  0xd0   :  { %1252 = vmatpush3.msra.mxu0 %v399_v6 }
  0xd1   :  { %1253 = vmatprep.subr.mxu0 %v1283_v25 }
  0xd2   :  { %1254 = vmatpush3.msra.mxu0 %v394_v10 }
  0xd3   :  { %1255 = vmatprep.subr.mxu0 %v1283_v25 }
  0xd4   :  { %1256 = vmatpush3.msra.mxu0 %v389_v12 }
  0xd5   :  { %1257 = vmatprep.subr.mxu0 %v1283_v25 }
  0xd6   :  { %1258 = vmatpush3.msra.mxu0 %v384_v11 }
  0xd7   :  { %1259 = vmatprep.subr.mxu0 %v1283_v25 }
  0xd8   :  { %1260 = vmatpush3.msra.mxu0 %v379_v14 }
  0xd9   :  { %1261 = vmatprep.subr.mxu0 %v1283_v25 }
  0xda   :  { %1262 = vmatpush3.msra.mxu0 %v374_v15 }
  0xdb   :  { %1263 = vmatprep.subr.mxu0 %v1283_v25 }
  0xdc   :  { %1264 = vmatpush3.msra.mxu0 %v369_v16 }
  0xdd   :  { %1265 = vmatprep.subr.mxu0 %v1283_v25 }
  0xde   :  { %1266 = vmatpush3.msra.mxu0 %v364_v17 }
  0xdf   :  { %1267 = vmatprep.subr.mxu0 %v1283_v25 }
  0xe0   :  { %1268 = vmatpush3.msra.mxu0 %v359_v18 }
  0xe1   :  { %1269 = vmatprep.subr.mxu0 %v1283_v25 }
  0xe2   :  { %1270 = vmatpush3.msra.mxu0 %v354_v19 }
  0xe3   :  { %1271 = vmatprep.subr.mxu0 %v1283_v25 }
  0xe4   :  { %1272 = vmatpush3.msra.mxu0 %v349_v20 }
  0xe5   :  { %1273 = vmatprep.subr.mxu0 %v1283_v25 }
  0xe6   :  { %1274 = vmatpush3.msra.mxu0 %v344_v22 }
  0xe7   :  { %1275 = vmatprep.subr.mxu0 %v1283_v25  ;;  %v450_v25 = vrot.slane %v415_v31, %v423_v53 }
  0xe8   :  { %1276 = vmatpush3.msra.mxu0 %v339_v23 }
  0xe9   :  { %1278 = vmatmul.mubr.f32.vlgmr.msra.gmra.mxu0 %v1916_v21  ;;  %v454_v21 = vrot.slane %v415_v31, %v427_v3 }
 0x102   :  { %v534_v24 = vpop.f32.mrf.mxu0 }
 0x103   :  { %v535_v45 = vadd.f32 %v534_v24, %v446_v36 }
 0x104   :  { %v536_v56 = vpop.f32.mrf.mxu0 }
 0x105   :  { %v605_v26 = vpop.f32.mrf.mxu1  ;;  %v537_v41 = vadd.f32 %v536_v56, %v450_v25 }
 0x106   :  { %v606_v3 = vadd.f32 %v605_v26, %v535_v45 }
 0x107   :  { %v607_v28 = vpop.f32.mrf.mxu1 }
 0x108   :  { %v608_v50 = vadd.f32 %v607_v28, %v537_v41 }
 0x124   :  { %v676_v27 = vpop.f32.mrf.mxu0 }
 0x125   :  { %v677_v60 = vadd.f32 %v676_v27, %v606_v3 }
 0x126   :  { %v678_v29 = vpop.f32.mrf.mxu0 }
 0x127   :  { %v679_v54 = vadd.f32 %v678_v29, %v608_v50 }
 0x129   :  { %v1109_v62 = vcombine.low %v677_v60, %v679_v54 }
 0x12b   :  { %v1117_v7 = vrot.slane %v1109_v62, %v1116_v63 }
 0x148   :  { %v747_v30 = vpop.f32.mrf.mxu1 }
 0x149   :  { %v748_v42 = vadd.f32 %v747_v30, %v454_v21 }
 0x14a   :  { %v749_v34 = vpop.f32.mrf.mxu1 }
 0x14b   :  { %v750_v39 = vadd.f32 %v749_v34, %v458_v33 }
 0x166   :  { %v818_v32 = vpop.f32.mrf.mxu0 }
 0x167   :  { %v819_v48 = vadd.f32 %v818_v32, %v748_v42 }
 0x168   :  { %v820_v37 = vpop.f32.mrf.mxu0 }
 0x169   :  { %v889_v38 = vpop.f32.mrf.mxu1  ;;  %v821_v43 = vadd.f32 %v820_v37, %v750_v39 }
 0x16a   :  { %v890_v59 = vadd.f32 %v889_v38, %v819_v48 }
 0x16b   :  { %v891_v47 = vpop.f32.mrf.mxu1 }
 0x16c   :  { %v892_v51 = vadd.f32 %v891_v47, %v821_v43 }
 0x16e   :  { %v1110_v61 = vcombine.low %v890_v59, %v892_v51 }
 0x170   :  { %v1124_v5 = vrot.slane %v1110_v61, %v1116_v63 }
 0x172   :  { %v1132_v0 = vcombine.low %v1117_v7, %v1124_v5 }
 0x174   :  { %v1139_v11 = vrot.slane %v1132_v0, %v1116_v63 }
 0x188   :  { %v1190_v40 = vpop.f32.mrf.mxu0 }
 0x18a   :  { %v1191_v49 = vpop.f32.mrf.mxu0 }
 0x18b   :  { %v1225_v53 = vpop.f32.mrf.mxu1  ;;  %v1192_v57 = vadd.f32 %v1191_v49, %v1190_v40 }
 0x18d   :  { %v1226_v58 = vpop.f32.mrf.mxu1  ;;  %v961_v2 = vadd.f32 %v1192_v57, %v462_v55 }
 0x18e   :  { %v1227_v4 = vadd.f32 %v1226_v58, %v1225_v53 }
 0x190   :  { %v1031_v8 = vadd.f32 %v1227_v4, %v961_v2 }
 0x1a9   :  { %v1100_v9 = vpop.f32.mrf.mxu0 }
 0x1aa   :  { %v1101_v6 = vadd.f32 %v1100_v9, %v1031_v8 }
 0x1ab   :  { %v1279_v10 = vpop.f32.mrf.mxu0 }
 0x1ac   :  { %v1131_v12 = vrot.slane %v1101_v6, %v1116_v63 }
 0x1ae   :  { %v1146_v14 = vrot.slane %v1131_v12, %v1116_v63 }
 0x1b0   :  { %v1147_v13 = vcombine.low %v1139_v11, %v1146_v14 }
 0x1b2   :  { %1153 = vst.msk [vmem:[%s2599_s3] sm:$0x1f] %vm1151_vm1, %v1147_v13 }

</bundles_post_ra>
